<compile_context>
chip_gen: v5e
topology: v5e:2x2
jax: 0.10.0
libtpu: 0.0.40
codegen_flags: <defaults>
</compile_context>

<pallas_src>
import functools
import math

import numpy as np
import jax
import jax.numpy as jnp
from jax import lax
from jax.experimental import pallas as pl
from jax.experimental.pallas import tpu as pltpu


def action_net_kernel(rlen_ref,      # SMEM (1,) int32 : actual region length (scalar prefetch)
                      nf_ref,        # (TB, 8, kF)     : streamed, lane-dense node-feature tile
                      rows_ref,      # (RT, F)         : [region rows | target row | pad] (resident)
                      w_n2l_ref,     # (F, D)
                      w_n2l_k_ref,   # (kF, D)         : w_n2l tiled k times (mean-row projection)
                      b_n2l_ref,     # (1, D)
                      w1a_ref,       # (D, H)          : linear_1 weight, node half
                      w1b_ref,       # (D, H)          : linear_1 weight, graph half
                      b1_ref,        # (1, H)
                      wout_ref,      # (H, D)
                      bout_ref,      # (1, D)
                      out_ref,       # (1, R_pad)      : action probabilities (lane-dense)
                      sum_acc,       # VMEM (8, kF) f32 : running node-feature sum
                      hpart,         # VMEM (R_pad, H) f32 : hoisted node_embed @ W1a
                      tgt_emb,       # VMEM (1, D) f32  : hoisted target embedding (post-ReLU)
                      *, inv_n, r_pad):
    step = pl.program_id(0)
    last = pl.num_programs(0) - 1
    cd = w_n2l_ref.dtype          # matmul compute dtype (f32 or bf16); accumulation is f32

    @pl.when(step == 0)
    def _init_and_hoist():
        sum_acc[...] = jnp.zeros_like(sum_acc)
        # Mean-independent MXU work runs on step 0 so it overlaps the streaming DMA.
        proj = jnp.dot(rows_ref[...].astype(cd), w_n2l_ref[...],
                       preferred_element_type=jnp.float32) + b_n2l_ref[...]       # (RT, D)
        proj = jnp.maximum(proj, 0.0)                                             # post-ReLU
        hpart[...] = jnp.dot(proj[:r_pad].astype(cd), w1a_ref[...],
                             preferred_element_type=jnp.float32)                  # (R, H)
        tgt_emb[...] = proj[r_pad:r_pad + 1]                                      # (1, D)

    # Streaming column sum; leading-axis reduce = pure VPU vreg adds (no cross-sublane work).
    sum_acc[...] += jnp.sum(nf_ref[...], axis=0)                                  # (8, kF)

    @pl.when(step == last)
    def _finalize():
        # graph_embed via linearity of the mean (pre-ReLU, as in the torch reference).
        sum_row = jnp.sum(sum_acc[...], axis=0, keepdims=True)                    # (1, kF)
        graph_proj = jnp.dot((sum_row * inv_n).astype(cd), w_n2l_k_ref[...],
                             preferred_element_type=jnp.float32) + b_n2l_ref[...]  # (1, D)
        # Split linear_1: relu(node_embed @ W1a + graph_embed @ W1b + b1).
        g_h = jnp.dot(graph_proj.astype(cd), w1b_ref[...],
                      preferred_element_type=jnp.float32) + b1_ref[...]           # (1, H)
        h = jnp.maximum(hpart[...] + g_h, 0.0)                                    # (R, H)
        raw_pred = jnp.dot(h.astype(cd), wout_ref[...],
                           preferred_element_type=jnp.float32) + bout_ref[...]    # (R, D)
        # Lane-dense scores: (1, R) = target_embed (1,D) contracted with raw_pred (R,D).
        scores = jnp.einsum('td,rd->tr', tgt_emb[...], raw_pred,
                            preferred_element_type=jnp.float32)                   # (1, R)
        # Mask padded action slots, then softmax over the lane axis.
        lane = lax.broadcasted_iota(jnp.int32, scores.shape, 1)
        scores = jnp.where(lane < rlen_ref[0], scores, -1e30)
        m = jnp.max(scores, axis=1, keepdims=True)
        e = jnp.exp(scores - m)
        denom = jnp.sum(e, axis=1, keepdims=True)
        out_ref[...] = e * pl.reciprocal(denom, approx=False)


def action_net_forward(node_features, params, region_start, region_len, target_node,
                       *, max_region, tile_bytes=4 * 1024 * 1024, use_bf16=False):
    nf = jnp.asarray(node_features, jnp.float32)
    N, F = nf.shape
    D = params["w_n2l"].shape[1]
    H = params["w1"].shape[1]

    region_start = jnp.asarray(region_start, jnp.int32)
    region_len = jnp.asarray(region_len, jnp.int32)
    target_node = jnp.asarray(target_node, jnp.int32)

    # Fixed (static) region capacity, padded to a sublane multiple; padded slots are masked.
    r_pad = max(8, ((int(max_region) + 7) // 8) * 8)
    rt_pad = r_pad + 8                       # + one 8-row group carrying the target row

    # --- O((R+1)*F) gather of the rows that feed w_n2l (traced indices -> no recompile) ---
    reg_idx = jnp.clip(region_start + jnp.arange(r_pad, dtype=jnp.int32), 0, N - 1)
    region_rows = jnp.take(nf, reg_idx, axis=0)                                   # (R_pad, F)
    target_row = jnp.take(nf, jnp.clip(target_node, 0, N - 1)[None], axis=0)      # (1, F)
    rows = jnp.concatenate(
        [region_rows, target_row, jnp.zeros((rt_pad - r_pad - 1, F), jnp.float32)], axis=0)

    # --- lane-dense streaming layout: (N, F) -> (groups, 8, k*F), k*F multiple of 128 ---
    k = (128 // F) if (F < 128 and 128 % F == 0) else 1
    kF = k * F
    row_group = 8 * k                                       # original rows per (8, kF) group
    itemsize = nf.dtype.itemsize
    n_groups = -(-N // row_group)
    groups_per_tile = max(1, int(tile_bytes) // (8 * kF * itemsize))   # size tile by BYTES
    groups_per_tile = min(groups_per_tile, n_groups)
    num_tiles = -(-n_groups // groups_per_tile)
    n_groups_pad = num_tiles * groups_per_tile
    n_pad = n_groups_pad * row_group
    if n_pad != N:
        nf = jnp.pad(nf, ((0, n_pad - N), (0, 0)))          # zero rows: no effect on the sum
    nf_stream = nf.reshape(n_groups_pad, 8, kF)             # row-major contiguous (free)

    # --- weights (pre-transposed (in, out)); linear_1 split, w_n2l tiled for the mean row ---
    w_dtype = jnp.bfloat16 if use_bf16 else jnp.float32
    w_n2l = params["w_n2l"].astype(w_dtype)                                       # (F, D)
    w_n2l_k = jnp.tile(params["w_n2l"], (k, 1)).astype(w_dtype)                   # (kF, D)
    w1a = params["w1"][:D].astype(w_dtype)                                        # (D, H)
    w1b = params["w1"][D:].astype(w_dtype)                                        # (D, H)
    wout = params["wout"].astype(w_dtype)                                         # (H, D)
    b_n2l = params["b_n2l"].astype(jnp.float32).reshape(1, D)
    b1 = params["b1"].astype(jnp.float32).reshape(1, H)
    bout = params["bout"].astype(jnp.float32).reshape(1, D)

    rlen = region_len.reshape(1)

    kernel = functools.partial(action_net_kernel, inv_n=1.0 / N, r_pad=r_pad)

    # VMEM budget derived from actual buffer sizes, capped for v7x's 64 MiB VMEM.
    stream_buf = groups_per_tile * 8 * kF * itemsize
    resident = (rows.nbytes + w_n2l.nbytes + w_n2l_k.nbytes + b_n2l.nbytes
                + w1a.nbytes + w1b.nbytes + b1.nbytes + wout.nbytes + bout.nbytes)
    scratch = 4 * (8 * kF + r_pad * H + D)
    vmem_limit = int(min(48 * 2**20,
                         max(16 * 2**20, 3 * stream_buf + 2 * resident + scratch + 4 * 2**20)))

    out = pl.pallas_call(
        kernel,
        out_shape=jax.ShapeDtypeStruct((1, r_pad), jnp.float32),
        grid_spec=pltpu.PrefetchScalarGridSpec(
            num_scalar_prefetch=1,
            grid=(num_tiles,),
            in_specs=[
                pl.BlockSpec((groups_per_tile, 8, kF), lambda i, rl: (i, 0, 0)),  # stream
                pl.BlockSpec((rt_pad, F), lambda i, rl: (0, 0)),                  # region+target
                pl.BlockSpec((F, D), lambda i, rl: (0, 0)),                       # weights resident
                pl.BlockSpec((kF, D), lambda i, rl: (0, 0)),
                pl.BlockSpec((1, D), lambda i, rl: (0, 0)),
                pl.BlockSpec((D, H), lambda i, rl: (0, 0)),
                pl.BlockSpec((D, H), lambda i, rl: (0, 0)),
                pl.BlockSpec((1, H), lambda i, rl: (0, 0)),
                pl.BlockSpec((H, D), lambda i, rl: (0, 0)),
                pl.BlockSpec((1, D), lambda i, rl: (0, 0)),
            ],
            out_specs=pl.BlockSpec((1, r_pad), lambda i, rl: (0, 0)),
            scratch_shapes=[
                pltpu.VMEM((8, kF), jnp.float32),        # running node-feature sum
                pltpu.VMEM((r_pad, H), jnp.float32),     # hoisted node_embed @ W1a
                pltpu.VMEM((1, D), jnp.float32),         # hoisted target embedding
            ],
        ),
        compiler_params=pltpu.CompilerParams(
            dimension_semantics=("arbitrary",),          # cross-step accumulator
            vmem_limit_bytes=vmem_limit,
        ),
    )(rlen, nf_stream, rows, w_n2l, w_n2l_k, b_n2l, w1a, w1b, b1, wout, bout)
    return out.reshape(-1)                               # (R_pad,), padded slots ~0


def reference_forward(node_features, params, region_start, region_len, target_node):
    """Pure-JAX reference mirroring the PyTorch forward semantics."""
    emb = node_features @ params["w_n2l"] + params["b_n2l"]
    graph_embed = jnp.mean(emb, axis=0, keepdims=True)
    node_embed_full = jnp.maximum(emb, 0.0)
    target_embed = node_embed_full[target_node]                          # (D,)
    node_embed = node_embed_full[region_start:region_start + region_len]
    embed_s_a = jnp.concatenate(
        [node_embed, jnp.tile(graph_embed, (region_len, 1))], axis=1)
    h = jnp.maximum(embed_s_a @ params["w1"] + params["b1"], 0.0)
    raw = h @ params["wout"] + params["bout"]
    scores = (raw @ target_embed.reshape(-1, 1)).reshape(-1)
    return jax.nn.softmax(scores)


def glorot_uniform(key, shape):
    if len(shape) == 2:
        fan_in, fan_out = shape
    else:
        fan_in = fan_out = int(np.prod(shape))
    limit = math.sqrt(6.0 / (fan_in + fan_out))
    return jax.random.uniform(key, shape, jnp.float32, -limit, limit)


def init_params(key, node_feat_dim, embed_dim, mlp_hidden):
    k = jax.random.split(key, 4)
    return {
        "w_n2l": glorot_uniform(k[0], (node_feat_dim, embed_dim)),
        "b_n2l": glorot_uniform(k[1], (1, embed_dim)),
        "w1": glorot_uniform(k[2], (2 * embed_dim, mlp_hidden)),
        "b1": jnp.zeros((1, mlp_hidden), jnp.float32),
        "wout": glorot_uniform(k[3], (mlp_hidden, embed_dim)),
        "bout": jnp.zeros((1, embed_dim), jnp.float32),
    }


if __name__ == "__main__":
    # Small synthetic shapes consistent with the module.
    N, F, D, H = 256, 16, 64, 64         # nodes, node feat dim, embed_dim, mlp_hidden
    MAX_REGION = 12                      # static action-region capacity (padded + masked)

    key = jax.random.PRNGKey(0)
    k_feat, k_params = jax.random.split(key)
    node_features = jax.random.normal(k_feat, (N, F), jnp.float32)
    params = init_params(k_params, F, D, H)

    fwd = jax.jit(action_net_forward,
                  static_argnames=("max_region", "tile_bytes", "use_bf16"))

    cases = [
        # multi-step grid (tiny byte budget -> several streamed tiles), aligned region
        dict(region_start=32, region_len=8, target_node=3, tile_bytes=8192),
        # unaligned region start, full max_region length, default (single-step) tiling
        dict(region_start=101, region_len=12, target_node=250, tile_bytes=4 * 1024 * 1024),
        # region shorter than max_region (exercises the -inf masking of padded slots)
        dict(region_start=7, region_len=5, target_node=0, tile_bytes=8192),
    ]

    for c in cases:
        probs = fwd(node_features, params,
                    c["region_start"], c["region_len"], c["target_node"],
                    max_region=MAX_REGION, tile_bytes=c["tile_bytes"])
        probs = np.asarray(jax.block_until_ready(probs))

        R = c["region_len"]
        ref = np.asarray(reference_forward(node_features, params,
                                           c["region_start"], R, c["target_node"]))
        # mean-then-project (kernel) vs project-then-mean (reference) reorders f32
        # reductions, so allow a slightly looser tolerance than bitwise parity.
        np.testing.assert_allclose(probs[:R], ref, rtol=5e-4, atol=1e-6)
        assert float(np.abs(probs[R:]).max(initial=0.0)) < 1e-6   # masked slots ~ 0
        assert abs(float(probs.sum()) - 1.0) < 1e-5

    print("KERNEL_OK")
</pallas_src>

<mosaic_0001>
module attributes {stable_mosaic.version = 11 : i64} {
  func.func @action_net_kernel(%arg0: i32, %arg1: memref<1xi32, #tpu.memory_space<smem>>, %arg2: memref<2x8x128xf32, #tpu.memory_space<vmem>>, %arg3: memref<24x16xf32, #tpu.memory_space<vmem>>, %arg4: memref<16x64xf32, #tpu.memory_space<vmem>>, %arg5: memref<128x64xf32, #tpu.memory_space<vmem>>, %arg6: memref<1x64xf32, #tpu.memory_space<vmem>>, %arg7: memref<64x64xf32, #tpu.memory_space<vmem>>, %arg8: memref<64x64xf32, #tpu.memory_space<vmem>>, %arg9: memref<1x64xf32, #tpu.memory_space<vmem>>, %arg10: memref<64x64xf32, #tpu.memory_space<vmem>>, %arg11: memref<1x64xf32, #tpu.memory_space<vmem>>, %arg12: memref<1x16xf32, #tpu.memory_space<vmem>>, %arg13: memref<8x128xf32, #tpu.memory_space<vmem>>, %arg14: memref<16x64xf32, #tpu.memory_space<vmem>>, %arg15: memref<1x64xf32, #tpu.memory_space<vmem>>) attributes {dimension_semantics = [#tpu.dimension_semantics<arbitrary>], iteration_bounds = array<i64: 2>, scalar_prefetch = 1 : i64, scratch_operands = 3 : i64, tpu.core_type = #tpu.core_type<tc>, window_params = [{transform_indices = @transform_0, window_bounds = array<i64: 2, 8, 128>}, {pipeline_mode = #tpu.pipeline_mode<synchronous>, transform_indices = @transform_1, window_bounds = array<i64: 24, 16>}, {pipeline_mode = #tpu.pipeline_mode<synchronous>, transform_indices = @transform_2, window_bounds = array<i64: 16, 64>}, {pipeline_mode = #tpu.pipeline_mode<synchronous>, transform_indices = @transform_3, window_bounds = array<i64: 128, 64>}, {pipeline_mode = #tpu.pipeline_mode<synchronous>, transform_indices = @transform_4, window_bounds = array<i64: 1, 64>}, {pipeline_mode = #tpu.pipeline_mode<synchronous>, transform_indices = @transform_5, window_bounds = array<i64: 64, 64>}, {pipeline_mode = #tpu.pipeline_mode<synchronous>, transform_indices = @transform_6, window_bounds = array<i64: 64, 64>}, {pipeline_mode = #tpu.pipeline_mode<synchronous>, transform_indices = @transform_7, window_bounds = array<i64: 1, 64>}, {pipeline_mode = #tpu.pipeline_mode<synchronous>, transform_indices = @transform_8, window_bounds = array<i64: 64, 64>}, {pipeline_mode = #tpu.pipeline_mode<synchronous>, transform_indices = @transform_9, window_bounds = array<i64: 1, 64>}, {pipeline_mode = #tpu.pipeline_mode<synchronous>, transform_indices = @transform_10, window_bounds = array<i64: 1, 16>}]} {
    %c0_i32 = arith.constant 0 : i32
    %0 = arith.cmpi eq, %arg0, %c0_i32 : i32
    %1 = arith.extui %0 : i1 to i32
    %c0_i32_0 = arith.constant 0 : i32
    %2 = arith.cmpi ne, %1, %c0_i32_0 : i32
    scf.if %2 {
      %cst_8 = arith.constant 0.000000e+00 : f32
      %11 = vector.broadcast %cst_8 : f32 to vector<8x128xf32>
      %c0_9 = arith.constant 0 : index
      %c0_10 = arith.constant 0 : index
      %12 = vector.load %arg13[%c0_9, %c0_10] : memref<8x128xf32, #tpu.memory_space<vmem>>, vector<8x128xf32>
      tpu.vector_store %arg13[%c0_9, %c0_10], %11 {strides = array<i32>} : memref<8x128xf32, #tpu.memory_space<vmem>>, vector<8x128xf32>,
      %c0_11 = arith.constant 0 : index
      %c0_12 = arith.constant 0 : index
      %13 = vector.load %arg3[%c0_11, %c0_12] : memref<24x16xf32, #tpu.memory_space<vmem>>, vector<24x16xf32>
      %c0_13 = arith.constant 0 : index
      %c0_14 = arith.constant 0 : index
      %14 = vector.load %arg4[%c0_13, %c0_14] : memref<16x64xf32, #tpu.memory_space<vmem>>, vector<16x64xf32>
      %cst_15 = arith.constant dense<0.000000e+00> : vector<24x64xf32>
      %15 = tpu.matmul %13, %14, %cst_15 {dimension_numbers = #tpu.dot_dimension_numbers<[1], [0], [0], [1], [0, 0, 1, 1], [], []>} : vector<24x16xf32>, vector<16x64xf32>, vector<24x64xf32> -> vector<24x64xf32>
      %c0_16 = arith.constant 0 : index
      %c0_17 = arith.constant 0 : index
      %16 = vector.load %arg6[%c0_16, %c0_17] : memref<1x64xf32, #tpu.memory_space<vmem>>, vector<1x64xf32>
      %17 = vector.broadcast %16 : vector<1x64xf32> to vector<24x64xf32>
      %18 = arith.addf %15, %17 : vector<24x64xf32>
      %cst_18 = arith.constant 0.000000e+00 : f32
      %19 = vector.broadcast %cst_18 : f32 to vector<24x64xf32>
      %20 = arith.maximumf %18, %19 : vector<24x64xf32>
      %21 = vector.extract_strided_slice %20 {offsets = [0, 0], sizes = [16, 64], strides = [1, 1]} : vector<24x64xf32> to vector<16x64xf32>
      %c0_19 = arith.constant 0 : index
      %c0_20 = arith.constant 0 : index
      %22 = vector.load %arg7[%c0_19, %c0_20] : memref<64x64xf32, #tpu.memory_space<vmem>>, vector<64x64xf32>
      %cst_21 = arith.constant dense<0.000000e+00> : vector<16x64xf32>
      %23 = tpu.matmul %21, %22, %cst_21 {dimension_numbers = #tpu.dot_dimension_numbers<[1], [0], [0], [1], [0, 0, 1, 1], [], []>} : vector<16x64xf32>, vector<64x64xf32>, vector<16x64xf32> -> vector<16x64xf32>
      %c0_22 = arith.constant 0 : index
      %c0_23 = arith.constant 0 : index
      %24 = vector.load %arg14[%c0_22, %c0_23] : memref<16x64xf32, #tpu.memory_space<vmem>>, vector<16x64xf32>
      tpu.vector_store %arg14[%c0_22, %c0_23], %23 {strides = array<i32>} : memref<16x64xf32, #tpu.memory_space<vmem>>, vector<16x64xf32>,
      %25 = vector.extract_strided_slice %20 {offsets = [16, 0], sizes = [1, 64], strides = [1, 1]} : vector<24x64xf32> to vector<1x64xf32>
      %c0_24 = arith.constant 0 : index
      %c0_25 = arith.constant 0 : index
      %26 = vector.load %arg15[%c0_24, %c0_25] : memref<1x64xf32, #tpu.memory_space<vmem>>, vector<1x64xf32>
      tpu.vector_store %arg15[%c0_24, %c0_25], %25 {strides = array<i32>} : memref<1x64xf32, #tpu.memory_space<vmem>>, vector<1x64xf32>,
    } else {
    }
    %c0 = arith.constant 0 : index
    %c0_1 = arith.constant 0 : index
    %3 = vector.load %arg13[%c0, %c0_1] : memref<8x128xf32, #tpu.memory_space<vmem>>, vector<8x128xf32>
    %c0_2 = arith.constant 0 : index
    %c0_3 = arith.constant 0 : index
    %c0_4 = arith.constant 0 : index
    %4 = vector.load %arg2[%c0_2, %c0_3, %c0_4] : memref<2x8x128xf32, #tpu.memory_space<vmem>>, vector<2x8x128xf32>
    %cst = arith.constant dense<0.000000e+00> : vector<8x128xf32>
    %5 = vector.multi_reduction <add>, %4, %cst [0] : vector<2x8x128xf32> to vector<8x128xf32>
    %6 = arith.addf %3, %5 : vector<8x128xf32>
    %c0_5 = arith.constant 0 : index
    %c0_6 = arith.constant 0 : index
    %7 = vector.load %arg13[%c0_5, %c0_6] : memref<8x128xf32, #tpu.memory_space<vmem>>, vector<8x128xf32>
    tpu.vector_store %arg13[%c0_5, %c0_6], %6 {strides = array<i32>} : memref<8x128xf32, #tpu.memory_space<vmem>>, vector<8x128xf32>,
    %c1_i32 = arith.constant 1 : i32
    %8 = arith.cmpi eq, %arg0, %c1_i32 : i32
    %9 = arith.extui %8 : i1 to i32
    %c0_i32_7 = arith.constant 0 : i32
    %10 = arith.cmpi ne, %9, %c0_i32_7 : i32
    scf.if %10 {
      %c0_8 = arith.constant 0 : index
      %c0_9 = arith.constant 0 : index
      %11 = vector.load %arg13[%c0_8, %c0_9] : memref<8x128xf32, #tpu.memory_space<vmem>>, vector<8x128xf32>
      %cst_10 = arith.constant dense<0.000000e+00> : vector<128xf32>
      %12 = vector.multi_reduction <add>, %11, %cst_10 [0] : vector<8x128xf32> to vector<128xf32>
      %13 = vector.shape_cast %12 : vector<128xf32> to vector<1x128xf32>
      %cst_11 = arith.constant 3.906250e-03 : f32
      %14 = vector.broadcast %cst_11 : f32 to vector<1x128xf32>
      %15 = arith.mulf %13, %14 : vector<1x128xf32>
      %c0_12 = arith.constant 0 : index
      %c0_13 = arith.constant 0 : index
      %16 = vector.load %arg5[%c0_12, %c0_13] : memref<128x64xf32, #tpu.memory_space<vmem>>, vector<128x64xf32>
      %cst_14 = arith.constant dense<0.000000e+00> : vector<1x64xf32>
      %17 = tpu.matmul %15, %16, %cst_14 {dimension_numbers = #tpu.dot_dimension_numbers<[1], [0], [0], [1], [0, 0, 1, 1], [], []>} : vector<1x128xf32>, vector<128x64xf32>, vector<1x64xf32> -> vector<1x64xf32>
      %c0_15 = arith.constant 0 : index
      %c0_16 = arith.constant 0 : index
      %18 = vector.load %arg6[%c0_15, %c0_16] : memref<1x64xf32, #tpu.memory_space<vmem>>, vector<1x64xf32>
      %19 = arith.addf %17, %18 : vector<1x64xf32>
      %c0_17 = arith.constant 0 : index
      %c0_18 = arith.constant 0 : index
      %20 = vector.load %arg8[%c0_17, %c0_18] : memref<64x64xf32, #tpu.memory_space<vmem>>, vector<64x64xf32>
      %cst_19 = arith.constant dense<0.000000e+00> : vector<1x64xf32>
      %21 = tpu.matmul %19, %20, %cst_19 {dimension_numbers = #tpu.dot_dimension_numbers<[1], [0], [0], [1], [0, 0, 1, 1], [], []>} : vector<1x64xf32>, vector<64x64xf32>, vector<1x64xf32> -> vector<1x64xf32>
      %c0_20 = arith.constant 0 : index
      %c0_21 = arith.constant 0 : index
      %22 = vector.load %arg9[%c0_20, %c0_21] : memref<1x64xf32, #tpu.memory_space<vmem>>, vector<1x64xf32>
      %23 = arith.addf %21, %22 : vector<1x64xf32>
      %c0_22 = arith.constant 0 : index
      %c0_23 = arith.constant 0 : index
      %24 = vector.load %arg14[%c0_22, %c0_23] : memref<16x64xf32, #tpu.memory_space<vmem>>, vector<16x64xf32>
      %25 = vector.broadcast %23 : vector<1x64xf32> to vector<16x64xf32>
      %26 = arith.addf %24, %25 : vector<16x64xf32>
      %cst_24 = arith.constant 0.000000e+00 : f32
      %27 = vector.broadcast %cst_24 : f32 to vector<16x64xf32>
      %28 = arith.maximumf %26, %27 : vector<16x64xf32>
      %c0_25 = arith.constant 0 : index
      %c0_26 = arith.constant 0 : index
      %29 = vector.load %arg10[%c0_25, %c0_26] : memref<64x64xf32, #tpu.memory_space<vmem>>, vector<64x64xf32>
      %cst_27 = arith.constant dense<0.000000e+00> : vector<16x64xf32>
      %30 = tpu.matmul %28, %29, %cst_27 {dimension_numbers = #tpu.dot_dimension_numbers<[1], [0], [0], [1], [0, 0, 1, 1], [], []>} : vector<16x64xf32>, vector<64x64xf32>, vector<16x64xf32> -> vector<16x64xf32>
      %c0_28 = arith.constant 0 : index
      %c0_29 = arith.constant 0 : index
      %31 = vector.load %arg11[%c0_28, %c0_29] : memref<1x64xf32, #tpu.memory_space<vmem>>, vector<1x64xf32>
      %32 = vector.broadcast %31 : vector<1x64xf32> to vector<16x64xf32>
      %33 = arith.addf %30, %32 : vector<16x64xf32>
      %c0_30 = arith.constant 0 : index
      %c0_31 = arith.constant 0 : index
      %34 = vector.load %arg15[%c0_30, %c0_31] : memref<1x64xf32, #tpu.memory_space<vmem>>, vector<1x64xf32>
      "tpu.trace_start"() <{level = 10 : i32, message = "td,rd->tr"}> : () -> ()
      %cst_32 = arith.constant dense<0.000000e+00> : vector<1x16xf32>
      %35 = tpu.matmul %34, %33, %cst_32 {dimension_numbers = #tpu.dot_dimension_numbers<[1], [1], [0], [0], [0, 0, 1, 0], [], []>} : vector<1x64xf32>, vector<16x64xf32>, vector<1x16xf32> -> vector<1x16xf32>
      "tpu.trace_stop"() : () -> ()
      %36 = tpu.iota {dimensions = array<i32: 1>} : vector<1x16xi32>
      %c0_33 = arith.constant 0 : index
      %37 = memref.load %arg1[%c0_33] : memref<1xi32, #tpu.memory_space<smem>>
      %38 = vector.broadcast %37 : i32 to vector<1x16xi32>
      %39 = arith.cmpi slt, %36, %38 : vector<1x16xi32>
      %cst_34 = arith.constant -1.000000e+30 : f32
      %40 = vector.broadcast %cst_34 : f32 to vector<1x16xf32>
      %41 = arith.select %39, %35, %40 : vector<1x16xi1>, vector<1x16xf32>
      %cst_35 = arith.constant dense<0xFF800000> : vector<1xf32>
      %42 = vector.multi_reduction <maximumf>, %41, %cst_35 [1] : vector<1x16xf32> to vector<1xf32>
      %43 = vector.shape_cast %42 : vector<1xf32> to vector<1x1xf32>
      %44 = vector.broadcast %43 : vector<1x1xf32> to vector<1x16xf32>
      %45 = arith.subf %41, %44 : vector<1x16xf32>
      %46 = math.exp %45 : vector<1x16xf32>
      %cst_36 = arith.constant dense<0.000000e+00> : vector<1xf32>
      %47 = vector.multi_reduction <add>, %46, %cst_36 [1] : vector<1x16xf32> to vector<1xf32>
      %48 = vector.shape_cast %47 : vector<1xf32> to vector<1x1xf32>
      %49 = tpu.reciprocal %48 : vector<1x1xf32> -> vector<1x1xf32>
      %50 = vector.broadcast %49 : vector<1x1xf32> to vector<1x16xf32>
      %51 = arith.mulf %46, %50 : vector<1x16xf32>
      %c0_37 = arith.constant 0 : index
      %c0_38 = arith.constant 0 : index
      %52 = vector.load %arg12[%c0_37, %c0_38] : memref<1x16xf32, #tpu.memory_space<vmem>>, vector<1x16xf32>
      tpu.vector_store %arg12[%c0_37, %c0_38], %51 {strides = array<i32>} : memref<1x16xf32, #tpu.memory_space<vmem>>, vector<1x16xf32>,
    } else {
    }
    return
  }
  func.func @transform_0(%arg0: i32, %arg1: memref<1xi32, #tpu.memory_space<smem>>) -> (i32, i32, i32) {
    %c0_i32 = arith.constant 0 : i32
    %c0_i32_0 = arith.constant 0 : i32
    %c0_i32_1 = arith.constant 0 : i32
    return %arg0, %c0_i32, %c0_i32_0 : i32, i32, i32
  }
  func.func @transform_1(%arg0: i32, %arg1: memref<1xi32, #tpu.memory_space<smem>>) -> (i32, i32) {
    %c0_i32 = arith.constant 0 : i32
    %c0_i32_0 = arith.constant 0 : i32
    %c0_i32_1 = arith.constant 0 : i32
    return %c0_i32, %c0_i32_0 : i32, i32
  }
  func.func @transform_2(%arg0: i32, %arg1: memref<1xi32, #tpu.memory_space<smem>>) -> (i32, i32) {
    %c0_i32 = arith.constant 0 : i32
    %c0_i32_0 = arith.constant 0 : i32
    %c0_i32_1 = arith.constant 0 : i32
    return %c0_i32, %c0_i32_0 : i32, i32
  }
  func.func @transform_3(%arg0: i32, %arg1: memref<1xi32, #tpu.memory_space<smem>>) -> (i32, i32) {
    %c0_i32 = arith.constant 0 : i32
    %c0_i32_0 = arith.constant 0 : i32
    %c0_i32_1 = arith.constant 0 : i32
    return %c0_i32, %c0_i32_0 : i32, i32
  }
  func.func @transform_4(%arg0: i32, %arg1: memref<1xi32, #tpu.memory_space<smem>>) -> (i32, i32) {
    %c0_i32 = arith.constant 0 : i32
    %c0_i32_0 = arith.constant 0 : i32
    %c0_i32_1 = arith.constant 0 : i32
    return %c0_i32, %c0_i32_0 : i32, i32
  }
  func.func @transform_5(%arg0: i32, %arg1: memref<1xi32, #tpu.memory_space<smem>>) -> (i32, i32) {
    %c0_i32 = arith.constant 0 : i32
    %c0_i32_0 = arith.constant 0 : i32
    %c0_i32_1 = arith.constant 0 : i32
    return %c0_i32, %c0_i32_0 : i32, i32
  }
  func.func @transform_6(%arg0: i32, %arg1: memref<1xi32, #tpu.memory_space<smem>>) -> (i32, i32) {
    %c0_i32 = arith.constant 0 : i32
    %c0_i32_0 = arith.constant 0 : i32
    %c0_i32_1 = arith.constant 0 : i32
    return %c0_i32, %c0_i32_0 : i32, i32
  }
  func.func @transform_7(%arg0: i32, %arg1: memref<1xi32, #tpu.memory_space<smem>>) -> (i32, i32) {
    %c0_i32 = arith.constant 0 : i32
    %c0_i32_0 = arith.constant 0 : i32
    %c0_i32_1 = arith.constant 0 : i32
    return %c0_i32, %c0_i32_0 : i32, i32
  }
  func.func @transform_8(%arg0: i32, %arg1: memref<1xi32, #tpu.memory_space<smem>>) -> (i32, i32) {
    %c0_i32 = arith.constant 0 : i32
    %c0_i32_0 = arith.constant 0 : i32
    %c0_i32_1 = arith.constant 0 : i32
    return %c0_i32, %c0_i32_0 : i32, i32
  }
  func.func @transform_9(%arg0: i32, %arg1: memref<1xi32, #tpu.memory_space<smem>>) -> (i32, i32) {
    %c0_i32 = arith.constant 0 : i32
    %c0_i32_0 = arith.constant 0 : i32
    %c0_i32_1 = arith.constant 0 : i32
    return %c0_i32, %c0_i32_0 : i32, i32
  }
  func.func @transform_10(%arg0: i32, %arg1: memref<1xi32, #tpu.memory_space<smem>>) -> (i32, i32) {
    %c0_i32 = arith.constant 0 : i32
    %c0_i32_0 = arith.constant 0 : i32
    %c0_i32_1 = arith.constant 0 : i32
    return %c0_i32, %c0_i32_0 : i32, i32
  }
}

</mosaic_0001>

<bundles_post_ra>
// kernel: action_net_forward.1
= control target key start
LH: loop header
LB: loop body
LE: loop exit
PB: predicated region body
PF: predicated region fallthrough
CT: control target
= control target key end

     0   :  { %s1037_s0 = inlined_call_operand.<no memory space> [shape: s32[1], index: 0, kind: input, shape index: {}]   ;;  %s1038_s1 = inlined_call_operand.vmem [shape: f32[4,8,128], index: 1, kind: input, shape index: {}]   ;;  %s1039_s2 = inlined_call_operand.vmem [shape: f32[24,16], index: 2, kind: input, shape index: {}]   ;;  %s1040_s3 = inlined_call_operand.vmem [shape: f32[16,64], index: 3, kind: input, shape index: {}]   ;;  %s1041_s4 = inlined_call_operand.vmem [shape: f32[128,64], index: 4, kind: input, shape index: {}]   ;;  %s1042_s5 = inlined_call_operand.vmem [shape: f32[1,64], index: 5, kind: input, shape index: {}]   ;;  %s1043_s6 = inlined_call_operand.vmem [shape: f32[64,64], index: 6, kind: input, shape index: {}]   ;;  %s1044_s7 = inlined_call_operand.vmem [shape: f32[64,64], index: 7, kind: input, shape index: {}]   ;;  %s1045_s8 = inlined_call_operand.vmem [shape: f32[1,64], index: 8, kind: input, shape index: {}]   ;;  %s1046_s9 = inlined_call_operand.vmem [shape: f32[64,64], index: 9, kind: input, shape index: {}]   ;;  %s1047_s10 = inlined_call_operand.vmem [shape: f32[1,64], index: 10, kind: input, shape index: {}]   ;;  %s1048_s11 = inlined_call_operand.hbm [shape: f32[1,16], index: 11, kind: output, shape index: {}]  }
   0x1   :  { %16 = sst [smem:[#allocation6]] %s1037_s0 }
   0x2   :  { %17 = vsyncpa [#allocation8], 0  ;;  %s851_s19 = smov 0  }
   0x3 LB: > { %s857_s20 = sadd.s32 4294967295, %s784_s19   ;;  %p694_p0 = scmp.ge.s32.totalorder %s784_s19, 1  ;;  %s784_s19 = sphi %s851_s19, %s23_s19  }
   0x4   : > { %p311_p1 = scmp.lt.s32.totalorder %s784_s19, 3 }
   0x6   : > { %p312_p2 = pnand %p694_p0, %p311_p1 }
   0x7   : > { %s695_s21 = sshll.u32 (!%p312_p2), %s857_s20, 1  ;;  %p697_p4 = scmp.ne.s32.totalorder (!%p312_p2), %s857_s20, 0 }
   0x8   : > { %315 = sbr.rel (%p312_p2) target bundleno = 1144 (0x478), region = 60  ;;  %p345_p3 = scmp.lt.s32.totalorder (!%p312_p2), %s695_s21, 3 }
   0xd   : > { %s1050_s21 = smov (!%p345_p3, %s695_s21), 3  ;;  %353 = sbr.rel (%p697_p4) target bundleno = 291 (0x123), region = 64 }
   0xe   : > { %s696_s0 = sshll.u32 %s1050_s21, 3 }
   0xf   : > { %s865_s24 = scalar_lea.vmem %s1038_s1, %s696_s0 }
  0x12   : > { %v359_v0 = vld [vmem:[%s1040_s3 + $0x8] sm:$0xff]  ;;  %v358_v1 = vld [vmem:[%s1040_s3] sm:$0xff]  ;;  %vm364_vm0 = vcmask 130048   ;;  %v786_v3 = vmov 0.0   ;;  %v410_v5 = vld [vmem:[%s1043_s6 + $0x38] sm:$0xff]  ;;  %vm411_vm1 = vcmask 523264  }
  0x13   : > { %714 = vmatpush.msra.mxu3 %v359_v0  ;;  %v356_v2 = vld [vmem:[%s1039_s2 + $0x8] sm:$0xff]  ;;  %354 = vst [vmem:[#allocation2] sm:$0xff] %v786_v3  ;;  %388 = vmatpush.msra.mxu0 %v359_v0  ;;  %v355_v4 = vld [vmem:[%s1039_s2] sm:$0xff]  ;;  %v409_v6 = vld [vmem:[%s1043_s6 + $0x30] sm:$0xff]  ;;  %vm443_vm2 = vcmask 516096  }
  0x14   : > { %716 = vmatpush.msra.mxu2 %v410_v5  ;;  %426 = vmatpush.msra.mxu1 %v410_v5  ;;  %v408_v7 = vld [vmem:[%s1043_s6 + $0x28] sm:$0xff]  ;;  %v407_v8 = vld [vmem:[%s1043_s6 + $0x20] sm:$0xff]  ;;  %v406_v9 = vld [vmem:[%s1043_s6 + $0x18] sm:$0xff] }
  0x15   : > { %715 = vmatpush.msra.mxu3 %v358_v1  ;;  %389 = vmatpush.msra.mxu0 %v358_v1  ;;  %v405_v10 = vld [vmem:[%s1043_s6 + $0x10] sm:$0xff]  ;;  %v404_v12 = vld [vmem:[%s1043_s6 + $0x8] sm:$0xff]  ;;  %v403_v13 = vld [vmem:[%s1043_s6] sm:$0xff] }
  0x16   : > { %699 = vmatmul.msk.f32.vlgmr.msra.gmra.mxu3 %vm364_vm0, %v356_v2  ;;  %698 = vmatmul.msk.f32.vlgmr.msra.gmra.mxu0 %vm364_vm0, %v355_v4  ;;  %v357_v11 = vld [vmem:[%s1039_s2 + $0x10] sm:$0xff]  ;;  %v740_v14 = vld [vmem:[%s1042_s5] ss:$0 sm:$0xff] }
  0x17   : > { %717 = vmatpush.msra.mxu2 %v409_v6  ;;  %427 = vmatpush.msra.mxu1 %v409_v6 }
  0x19   : > { %718 = vmatpush.msra.mxu2 %v408_v7  ;;  %428 = vmatpush.msra.mxu1 %v408_v7 }
  0x1b   : > { %719 = vmatpush.msra.mxu2 %v407_v8  ;;  %429 = vmatpush.msra.mxu1 %v407_v8 }
  0x1d   : > { %720 = vmatpush.msra.mxu2 %v406_v9  ;;  %430 = vmatpush.msra.mxu1 %v406_v9 }
  0x1e   : > { %700 = vmatmul.msk.f32.gmra.mxu3 %vm364_vm0, %v357_v11 }
  0x1f   : > { %721 = vmatpush.msra.mxu2 %v405_v10  ;;  %431 = vmatpush.msra.mxu1 %v405_v10 }
  0x21   : > { %722 = vmatpush.msra.mxu2 %v404_v12  ;;  %432 = vmatpush.msra.mxu1 %v404_v12 }
  0x23   : > { %723 = vmatpush.msra.mxu2 %v403_v13  ;;  %433 = vmatpush.msra.mxu1 %v403_v13 }
  0x93   : > { %v391_v15 = vpop.f32.mrf.mxu0 }
  0x94   : > { %v392_v16 = vadd.f32 %v740_v14, %v391_v15 }
  0x96   : > { %v400_v17 = vmax.f32 %v392_v16, 0.0 }
  0x98   : > { %701 = vmatmul.msk.f32.vlgmr.msra.gmra.mxu1 %vm411_vm1, %v400_v17 }
  0x99   : > { %v394_v18 = vpop.f32.mrf.mxu3 }
  0x9a   : > { %v395_v19 = vadd.f32 %v740_v14, %v394_v18 }
  0x9c   : > { %v401_v20 = vmax.f32 %v395_v19, 0.0 }
  0x9e   : > { %702 = vmatmul.msk.f32.vlgmr.msra.gmra.mxu2 %vm411_vm1, %v401_v20 }
  0xa1   : > { %v397_v21 = vpop.f32.mrf.mxu3 }
  0xa2   : > { %v398_v22 = vadd.f32 %v740_v14, %v397_v21 }
  0xa4   : > { %v402_v23 = vmax.f32 %v398_v22, 0.0 }
  0xa6   : > { %444 = vst.msk [vmem:[#allocation4] sm:$0x1] %vm443_vm2, %v402_v23 }
 0x115   : > { %v435_v24 = vpop.f32.mrf.mxu1 }
 0x116   : > { %441 = vst.msk [vmem:[#allocation3] sm:$0xff] %vm411_vm1, %v435_v24 }
 0x121   : > { %v438_v25 = vpop.f32.mrf.mxu2 }
 0x122   : > { %442 = vst.msk [vmem:[#allocation3 + $0x8] sm:$0xff] %vm411_vm1, %v438_v25 }
 0x123 PF: > { %v445_v26 = vld [vmem:[#allocation2] sm:$0xff]  ;;  %v447_v28 = vld [vmem:[%s865_s24 + $0x8] sm:$0xff]  ;;  %p703_p5 = scmp.ne.s32.totalorder %s857_s20, 1 }
 0x124   : > { %v446_v27 = vld [vmem:[%s865_s24] sm:$0xff]  ;;  %s613_s15 = sld [smem:[#allocation6]] (!%p703_p5) }
 0x125   : > { %v448_v29 = vadd.f32 %v447_v28, %v446_v27  ;;  %454 = sbr.rel (%p703_p5) target bundleno = 1139 (0x473), region = 68 }
 0x127   : > { %v449_v30 = vadd.f32 %v448_v29, %v445_v26 }
 0x129   : > { %450 = vst [vmem:[#allocation2] sm:$0xff] %v449_v30 }
 0x12a   : > { %v478_v31 = vld [vmem:[%s1041_s4 + $0x78] sm:$0xff]  ;;  %v477_v32 = vld [vmem:[%s1041_s4 + $0x70] sm:$0xff]  ;;  %v476_v33 = vld [vmem:[%s1041_s4 + $0x68] sm:$0xff]  ;;  %vm509_vm3 = vcmask 523264   ;;  %v611_v26 = vlaneseq  ;;  %v614_v28 = vstv %s613_s15  ;;  %vm617_vm5 = vcmask 122880  }
 0x12b   : > { %480 = vmatpush.msra.mxu0 %v478_v31  ;;  %v475_v34 = vld [vmem:[%s1041_s4 + $0x60] sm:$0xff]  ;;  %v507_v36 = vld [vmem:[%s1044_s7 + $0x38] sm:$0xff]  ;;  %v506_v39 = vld [vmem:[%s1044_s7 + $0x30] sm:$0xff] }
 0x12c   : > { %v474_v37 = vld [vmem:[%s1041_s4 + $0x58] sm:$0xff]  ;;  %521 = vmatpush.msra.mxu1 %v507_v36  ;;  %v505_v40 = vld [vmem:[%s1044_s7 + $0x28] sm:$0xff]  ;;  %v473_v41 = vld [vmem:[%s1041_s4 + $0x50] sm:$0xff]  ;;  %v612_v27 = vand.u32 127, %v611_v26 }
 0x12d   : > { %481 = vmatpush.msra.mxu0 %v477_v32  ;;  %v504_v43 = vld [vmem:[%s1044_s7 + $0x20] sm:$0xff]  ;;  %v472_v44 = vld [vmem:[%s1041_s4 + $0x48] sm:$0xff]  ;;  %v503_v45 = vld [vmem:[%s1044_s7 + $0x18] sm:$0xff] }
 0x12e   : > { %522 = vmatpush.msra.mxu1 %v506_v39  ;;  %v471_v46 = vld [vmem:[%s1041_s4 + $0x40] sm:$0xff]  ;;  %v502_v48 = vld [vmem:[%s1044_s7 + $0x10] sm:$0xff]  ;;  %v470_v49 = vld [vmem:[%s1041_s4 + $0x38] sm:$0xff]  ;;  %vm615_vm4 = vcmp.lt.s32.totalorder %v612_v27, %v614_v28 }
 0x12f   : > { %482 = vmatpush.msra.mxu0 %v476_v33  ;;  %v469_v50 = vld [vmem:[%s1041_s4 + $0x30] sm:$0xff]  ;;  %v468_v52 = vld [vmem:[%s1041_s4 + $0x28] sm:$0xff]  ;;  %v467_v53 = vld [vmem:[%s1041_s4 + $0x20] sm:$0xff] }
 0x130   : > { %v455_v35 = vld [vmem:[#allocation2] sm:$0xff]  ;;  %523 = vmatpush.msra.mxu1 %v505_v40  ;;  %v466_v55 = vld [vmem:[%s1041_s4 + $0x18] sm:$0xff]  ;;  %v465_v56 = vld [vmem:[%s1041_s4 + $0x10] sm:$0xff] }
 0x131   : > { %v456_v38 = vrot.slane %v455_v35, 4  ;;  %483 = vmatpush.msra.mxu0 %v475_v34  ;;  %v464_v58 = vld [vmem:[%s1041_s4 + $0x8] sm:$0xff]  ;;  %v463_v59 = vld [vmem:[%s1041_s4] sm:$0xff]  ;;  %v547_v63 = vld [vmem:[%s1046_s9 + $0x38] sm:$0xff] }
 0x132   : > { %524 = vmatpush.msra.mxu1 %v504_v43  ;;  %v501_v61 = vld [vmem:[%s1044_s7 + $0x8] sm:$0xff]  ;;  %v500_v62 = vld [vmem:[%s1044_s7] sm:$0xff]  ;;  %v546_v0 = vld [vmem:[%s1046_s9 + $0x30] sm:$0xff]  ;;  %566 = vmatpush.msra.mxu2 %v547_v63 }
 0x133   : > { %v457_v42 = vadd.f32 %v456_v38, %v455_v35  ;;  %484 = vmatpush.msra.mxu0 %v474_v37  ;;  %v545_v1 = vld [vmem:[%s1046_s9 + $0x28] sm:$0xff]  ;;  %v479_v2 = vld [vmem:[%s1042_s5] sm:$0x1]  ;;  %v543_v6 = vld [vmem:[%s1046_s9 + $0x18] sm:$0xff] }
 0x134   : > { %525 = vmatpush.msra.mxu1 %v503_v45  ;;  %567 = vmatpush.msra.mxu2 %v546_v0  ;;  %v544_v5 = vld [vmem:[%s1046_s9 + $0x20] sm:$0xff]  ;;  %v542_v7 = vld [vmem:[%s1046_s9 + $0x10] sm:$0xff]  ;;  %v541_v8 = vld [vmem:[%s1046_s9 + $0x8] sm:$0xff] }
 0x135   : > { %485 = vmatpush.msra.mxu0 %v473_v41  ;;  %v458_v47 = vrot.slane %v457_v42, 2  ;;  %v540_v9 = vld [vmem:[%s1046_s9] sm:$0xff]  ;;  %v533_v13 = vld [vmem:[#allocation3] sm:$0xff]  ;;  %v534_v17 = vld [vmem:[#allocation3 + $0x8] sm:$0xff] }
 0x136   : > { %526 = vmatpush.msra.mxu1 %v502_v48  ;;  %568 = vmatpush.msra.mxu2 %v545_v1  ;;  %v508_v10 = vld [vmem:[%s1045_s8] sm:$0x1]  ;;  %v581_v25 = vld [vmem:[#allocation4] sm:$0x1] }
 0x137   : > { %486 = vmatpush.msra.mxu0 %v472_v44  ;;  %v459_v51 = vadd.f32 %v458_v47, %v457_v42  ;;  %v741_v21 = vld [vmem:[%s1047_s10] ss:$0 sm:$0xff] }
 0x138   : > { %527 = vmatpush.msra.mxu1 %v501_v61  ;;  %569 = vmatpush.msra.mxu2 %v544_v5 }
 0x139   : > { %487 = vmatpush.msra.mxu0 %v471_v46  ;;  %v460_v54 = vrot.slane %v459_v51, 1 }
 0x13a   : > { %528 = vmatpush.msra.mxu1 %v500_v62  ;;  %570 = vmatpush.msra.mxu2 %v543_v6 }
 0x13b   : > { %488 = vmatpush.msra.mxu0 %v470_v49  ;;  %v461_v57 = vadd.f32 %v460_v54, %v459_v51 }
 0x13c   : > { %571 = vmatpush.msra.mxu2 %v542_v7 }
 0x13d   : > { %489 = vmatpush.msra.mxu0 %v469_v50  ;;  %v462_v60 = vmul.f32 0.00390625, %v461_v57 }
 0x13e   : > { %572 = vmatpush.msra.mxu2 %v541_v8 }
 0x13f   : > { %490 = vmatpush.msra.mxu0 %v468_v52 }
 0x140   : > { %573 = vmatpush.msra.mxu2 %v540_v9 }
 0x141   : > { %491 = vmatpush.msra.mxu0 %v467_v53 }
 0x143   : > { %492 = vmatpush.msra.mxu0 %v466_v55 }
 0x145   : > { %493 = vmatpush.msra.mxu0 %v465_v56 }
 0x147   : > { %494 = vmatpush.msra.mxu0 %v464_v58 }
 0x149   : > { %495 = vmatpush.msra.mxu0 %v463_v59 }
 0x14a   : > { %496 = vmatmul.f32.vlgmr.msra.gmra.mxu0 %v462_v60 }
 0x1c7   : > { %v497_v3 = vpop.f32.mrf.mxu0 }
 0x1c8   : > { %v498_v4 = vadd.f32 %v497_v3, %v479_v2 }
 0x1ca   : > { %704 = vmatmul.msk.f32.vlgmr.msra.gmra.mxu1 %vm509_vm3, %v498_v4 }
 0x247   : > { %v530_v11 = vpop.f32.mrf.mxu1 }
 0x248   : > { %v531_v12 = vadd.f32 %v530_v11, %v508_v10 }
 0x24a   : > { %v535_v14 = vperm.slane %v531_v12, 0 }
 0x24c   : > { %v536_v15 = vadd.f32 %v535_v14, %v533_v13  ;;  %v537_v18 = vadd.f32 %v535_v14, %v534_v17 }
 0x24e   : > { %v538_v16 = vmax.f32 %v536_v15, 0.0  ;;  %v539_v19 = vmax.f32 %v537_v18, 0.0 }
 0x250   : > { %705 = vmatmul.msk.f32.vlgmr.msra.gmra.mxu2 %vm509_vm3, %v538_v16 }
 0x258   : > { %706 = vmatmul.msk.f32.gmra.mxu2 %vm509_vm3, %v539_v19 }
 0x2d3   : > { %v575_v20 = vpop.f32.mrf.mxu2 }
 0x2d4   : > { %v576_v24 = vadd.f32 %v741_v21, %v575_v20 }
 0x2db   : > { %v578_v22 = vpop.f32.mrf.mxu2 }
 0x2dc   : > { %v579_v23 = vadd.f32 %v741_v21, %v578_v22 }
 0x2de   : > { %707 = vmatpush.xpose.msk.msra.mxu3 %vm509_vm3, %v579_v23 }
 0x2e2   : > { %708 = vmatpush.xpose.msk.msra.mxu3 %vm509_vm3, %v576_v24 }
 0x2e5   : > { %709 = vmatmul.msk.f32.vlgmr.msra.gmra.mxu3 %vm509_vm3, %v581_v25 }
 0x368   : > { %v608_v29 = vpop.f32.mrf.mxu3 }
 0x369   : > { %v616_v30 = vsel %vm615_vm4, %v608_v29, -1e+30 }
 0x36a   : > { %v618_v31 = vsel %vm617_vm5, %v616_v30, -inf }
 0x36b   : > { %619 = vmax.xlane.f32.xlu0 %v618_v31 }
 0x3de   : > { %v620_v32 = vpop.xlane.xlu0 %619 }
 0x3df   : > { %v621_v33 = vsub.f32 %v616_v30, %v620_v32 }
 0x3e1   : > { %v622_v34 = vmul.f32 1.442695, %v621_v33 }
 0x3e3   : > { %742 = vpow2.f32 %v622_v34 }
 0x3e9   : > { %v743_v35 = vpop.eup %742 }
 0x3ea   : > { %v624_v36 = vsel %vm617_vm5, %v743_v35, 0.0 }
 0x3eb   : > { %625 = vadd.xlane.f32.xlu0 %v624_v36 }
 0x45e   : > { %v626_v37 = vpop.xlane.xlu0 %625 }
 0x45f   : > { %744 = vrcp.f32 %v626_v37  ;;  %v638_v41 = vand.u32 2147483648, %v626_v37  ;;  %v636_v43 = vand.u32 2147483647, %v626_v37  ;;  %vm632_vm7 = vweird.f32 %v626_v37 }
 0x461   : > { %v639_v45 = vor.u32 1.1754944e-38, %v638_v41  ;;  %vm637_vm9 = vcmp.eq.f32.partialorder %v636_v43, 8.507059e+37 }
 0x465   : > { %v745_v38 = vpop.eup %744 }
 0x466   : > { %v628_v39 = vmul.f32 %v745_v38, %v626_v37  ;;  %vm633_vm6 = vweird.f32 %v745_v38 }
 0x467   : > { %vm634_vm8 = vmor %vm632_vm7, %vm633_vm6 }
 0x468   : > { %v629_v40 = vsub.f32 1.0, %v628_v39 }
 0x46a   : > { %v630_v42 = vmul.f32 %v745_v38, %v629_v40 }
 0x46c   : > { %v631_v44 = vadd.f32 %v745_v38, %v630_v42 }
 0x46e   : > { %v635_v46 = vsel %vm634_vm8, %v745_v38, %v631_v44 }
 0x46f   : > { %v640_v47 = vsel %vm637_vm9, %v639_v45, %v635_v46 }
 0x470   : > { %v641_v48 = vmul.f32 %v743_v35, %v640_v47 }
 0x472   : > { %642 = vst.msk [vmem:[#allocation7] sm:$0x1] %vm617_vm5, %v641_v48 }
 0x473 PF: > { %p728_p6 = scmp.eq.s32.totalorder %s857_s20, 1  ;;  %s787_s16 = smov [#allocation7]  }
 0x474   : > { %s649_s17 = sshll.u32 %s787_s16, 4  ;;  %s651_s0 = sshll.u32 %s1048_s11, 4  ;;  %s650_s17 = int_to_ptr.vmem [resolvable:$true] %s649_s17  ;;  %s652_s0 = int_to_ptr.hbm [resolvable:$true] %s651_s0 }
 0x475   : > { %725 = dma.vmem_to_hbm [thread:$0]  (%p728_p6), %s650_s17, 16, %s652_s0, [#allocation8]  }
 0x476   : > { %779 = dma.done.wait (%p728_p6), [#allocation8], 16  }
 0x477   : > { %781 = vsyncadd (%p728_p6), [#allocation8], 4294967280 }
 0x478 PF: > { %s23_s19 = sadd.s32 1, %s784_s19  }
 0x479   : > { %p20_p7 = scmp.ge.s32.totalorder %s23_s19, 4  }
 0x47b   :  { %22 = sbr.rel (!%p20_p7) target bundleno = 3 (0x3), region = 95 }
 0x480   :  { %665 = vsyncpa [#allocation8], 1 }
 0x481   :  { %667 = vsyncpa [#allocation8 + $0x1], 1 }

</bundles_post_ra>
